<compile_context>
chip_gen: v5e
topology: v5e:2x2
jax: 0.10.0
libtpu: 0.0.40
codegen_flags: <defaults>
</compile_context>

<pallas_src>
import functools

import jax
import jax.numpy as jnp
from jax import lax
from jax.experimental import pallas as pl
from jax.experimental.pallas import tpu as pltpu


def _encoder1_kernel(x_ref, w_ref, b_ref, o_ref, *, W):
    # x_ref : (1, 3, Cin, M)  kh-pre-shifted, H-reflection-padded input planes.
    #                         channels on sublanes, flat spatial (lane-dense) on lanes.
    # w_ref : (Cout, 27)      fused (conv1 o conv2) weights, columns ordered (kh, kw, cin).
    # b_ref : (Cout, 1)       fused bias.
    # o_ref : (1, Cout, M)    NCHW-flat output tile (lane-dense last dim).
    M = x_ref.shape[-1]
    cin = x_ref.shape[2]

    # Column index (mod W) masks for the in-kernel reflection along W.
    col = lax.broadcasted_iota(jnp.int32, (cin, M), 1) % W
    at_left = col == 0            # output column j == 0     (needs col -1 -> reflect to col 1)
    at_right = col == (W - 1)     # output column j == W - 1 (needs col W  -> reflect to col W-2)

    acc = None
    for kh in range(3):
        plane = x_ref[0, kh]                                              # (Cin, M)
        # kw = 0 / 2 neighbours via one-lane shifts on the flat spatial axis
        # (XLU work; the wrapped-in filler lanes are overwritten by the masks).
        left = jnp.concatenate([plane[:, :1], plane[:, :-1]], axis=1)     # value[m] = plane[m-1]
        right = jnp.concatenate([plane[:, 1:], plane[:, -1:]], axis=1)    # value[m] = plane[m+1]
        # Reflection fix-ups at the row edges.
        left_f = jnp.where(at_left, right, left)
        right_f = jnp.where(at_right, left, right)
        taps = jnp.concatenate([left_f, plane, right_f], axis=0)          # (9, M), row = kw*Cin + c
        part = jnp.dot(w_ref[:, kh * 9:(kh + 1) * 9], taps,
                       preferred_element_type=jnp.float32)                # (Cout, M), MXU
        acc = part if acc is None else acc + part

    z = jnp.maximum(acc + b_ref[...], 0.0)                                # bias + ReLU, lane-dense
    o_ref[0] = z.astype(o_ref.dtype)


def _choose_row_tile(H, W, max_tile_elems):
    """Largest row tile TH dividing H with TH*W a multiple of 128 and <= budget."""
    candidates = [th for th in range(1, H + 1)
                  if H % th == 0 and (th * W) % 128 == 0 and th * W <= max_tile_elems]
    return max(candidates) if candidates else H


def encoder1_forward(x_nchw, w1, b1, w2, b2, *, max_tile_elems=2048):
    """x_nchw: (B, 3, H, W) float32.  Returns (B, 64, H, W) float32."""
    B, Cin, H, W = x_nchw.shape
    Cout = w2.shape[0]
    HW = H * W

    # --- Fold conv1 (1x1, 3->3) + bias into conv2 (3x3, 3->64).  Exact because
    #     reflection padding commutes with a pointwise conv and a constant bias.
    w1m = w1[:, :, 0, 0]                                        # (Cmid, Cin)
    w_eff = jnp.einsum("omhw,mc->ohwc", w2, w1m)                # (Cout, kh, kw, Cin)
    w_fused = w_eff.reshape(Cout, 9 * Cin)                      # columns ordered (kh, kw, cin)
    b_fused = (b2 + jnp.einsum("omhw,m->o", w2, b1)).reshape(Cout, 1)

    # --- Input prep (cheap: input is 3 channels vs. 64 output channels).
    #     Reflection-pad along H only; W reflection is handled in-kernel.
    #     Pre-shift the 3 kh taps so row tiles along the flat spatial axis are
    #     non-overlapping (halo handled outside the kernel, no dynamic slicing).
    xh = jnp.pad(x_nchw, ((0, 0), (0, 0), (1, 1), (0, 0)), mode="reflect")   # (B, Cin, H+2, W)
    xsh = jnp.stack(
        [xh[:, :, kh:kh + H, :].reshape(B, Cin, HW) for kh in range(3)],
        axis=1)                                                              # (B, 3, Cin, H*W)

    TH = _choose_row_tile(H, W, max_tile_elems)
    n_tiles = H // TH
    M = TH * W                                                  # lane-dense tile width

    kernel = functools.partial(_encoder1_kernel, W=W)
    out_flat = pl.pallas_call(
        kernel,
        out_shape=jax.ShapeDtypeStruct((B, Cout, HW), jnp.float32),
        grid_spec=pltpu.PrefetchScalarGridSpec(
            num_scalar_prefetch=0,
            grid=(B, n_tiles),
            in_specs=[
                pl.BlockSpec((1, 3, Cin, M), lambda b, t: (b, 0, 0, t)),
                pl.BlockSpec((Cout, 9 * Cin), lambda b, t: (0, 0)),   # resident weights
                pl.BlockSpec((Cout, 1), lambda b, t: (0, 0)),         # resident bias
            ],
            out_specs=pl.BlockSpec((1, Cout, M), lambda b, t: (b, 0, t)),
        ),
        compiler_params=pltpu.CompilerParams(
            dimension_semantics=("parallel", "parallel"),
            vmem_limit_bytes=32 * 1024 * 1024,
        ),
    )(xsh, w_fused, b_fused)

    # Free reshape (no data movement): (B, 64, H*W) -> (B, 64, H, W), NCHW-native.
    return out_flat.reshape(B, Cout, H, W)


def encoder1_reference(x_nchw, w1, b1, w2, b2):
    """Pure-JAX reference (NCHW, same semantics as the PyTorch module)."""
    y = jax.lax.conv_general_dilated(
        x_nchw, w1, window_strides=(1, 1), padding="VALID",
        dimension_numbers=("NCHW", "OIHW", "NCHW"))
    y = y + b1.reshape(1, -1, 1, 1)
    y = jnp.pad(y, ((0, 0), (0, 0), (1, 1), (1, 1)), mode="reflect")
    z = jax.lax.conv_general_dilated(
        y, w2, window_strides=(1, 1), padding="VALID",
        dimension_numbers=("NCHW", "OIHW", "NCHW"))
    z = z + b2.reshape(1, -1, 1, 1)
    return jnp.maximum(z, 0.0)


if __name__ == "__main__":
    key = jax.random.PRNGKey(0)
    kx, k1w, k1b, k2w, k2b = jax.random.split(key, 5)

    B, Cin, H, W, Cout = 2, 3, 16, 16, 64
    x = jax.random.normal(kx, (B, Cin, H, W), dtype=jnp.float32)

    # Deterministic parameter init (same shapes as the PyTorch module).
    w1 = jax.random.normal(k1w, (3, 3, 1, 1), dtype=jnp.float32) * 0.1
    b1 = jax.random.normal(k1b, (3,), dtype=jnp.float32) * 0.1
    w2 = jax.random.normal(k2w, (64, 3, 3, 3), dtype=jnp.float32) * 0.1
    b2 = jax.random.normal(k2b, (64,), dtype=jnp.float32) * 0.1

    # max_tile_elems=128 forces TH=8 -> a 2-row-tile grid even at this tiny
    # size, so the tiled path (lane-dense 128-wide output blocks, tile-boundary
    # reflection masks) is what actually gets exercised and checked.
    out = encoder1_forward(x, w1, b1, w2, b2, max_tile_elems=128)
    out = jax.block_until_ready(out)

    ref = encoder1_reference(x, w1, b1, w2, b2)
    assert out.shape == (B, Cout, H, W), out.shape
    assert jnp.allclose(out, ref, atol=1e-4, rtol=1e-4), "mismatch vs reference"

    print("KERNEL_OK")
</pallas_src>

<mosaic_0001>
module attributes {stable_mosaic.version = 11 : i64} {
  func.func @_encoder1_kernel(%arg0: i32, %arg1: i32, %arg2: memref<1x3x3x128xf32, #tpu.memory_space<vmem>>, %arg3: memref<64x27xf32, #tpu.memory_space<vmem>>, %arg4: memref<64x1xf32, #tpu.memory_space<vmem>>, %arg5: memref<1x64x128xf32, #tpu.memory_space<vmem>>) attributes {dimension_semantics = [#tpu.dimension_semantics<parallel>, #tpu.dimension_semantics<parallel>], iteration_bounds = array<i64: 2, 2>, scalar_prefetch = 0 : i64, scratch_operands = 0 : i64, tpu.core_type = #tpu.core_type<tc>, window_params = [{transform_indices = @transform_0, window_bounds = array<i64: 1, 3, 3, 128>}, {pipeline_mode = #tpu.pipeline_mode<synchronous>, transform_indices = @transform_1, window_bounds = array<i64: 64, 27>}, {pipeline_mode = #tpu.pipeline_mode<synchronous>, transform_indices = @transform_2, window_bounds = array<i64: 64, 1>}, {transform_indices = @transform_3, window_bounds = array<i64: 1, 64, 128>}]} {
    %0 = tpu.iota {dimensions = array<i32: 1>} : vector<3x128xi32>
    %c16_i32 = arith.constant 16 : i32
    %c0_i32 = arith.constant 0 : i32
    %1 = arith.cmpi eq, %c16_i32, %c0_i32 : i32
    %c1_i32 = arith.constant 1 : i32
    %2 = arith.select %1, %c1_i32, %c16_i32 : i32
    %3 = vector.broadcast %2 : i32 to vector<3x128xi32>
    %4 = arith.remsi %0, %3 : vector<3x128xi32>
    %c0_i32_0 = arith.constant 0 : i32
    %5 = vector.broadcast %c0_i32_0 : i32 to vector<3x128xi32>
    %6 = arith.cmpi ne, %4, %5 : vector<3x128xi32>
    %c0_i32_1 = arith.constant 0 : i32
    %7 = vector.broadcast %c0_i32_1 : i32 to vector<3x128xi32>
    %8 = arith.cmpi slt, %4, %7 : vector<3x128xi32>
    %c0_i32_2 = arith.constant 0 : i32
    %9 = arith.cmpi slt, %2, %c0_i32_2 : i32
    %10 = vector.broadcast %9 : i1 to vector<3x128xi1>
    %11 = vector.broadcast %10 : vector<3x128xi1> to vector<3x128xi1>
    %12 = arith.xori %8, %11 : vector<3x128xi1>
    %13 = arith.andi %12, %6 : vector<3x128xi1>
    %14 = vector.broadcast %2 : i32 to vector<3x128xi32>
    %15 = arith.addi %4, %14 : vector<3x128xi32>
    %16 = arith.select %13, %15, %4 : vector<3x128xi1>, vector<3x128xi32>
    %c0_i32_3 = arith.constant 0 : i32
    %17 = vector.broadcast %c0_i32_3 : i32 to vector<3x128xi32>
    %18 = arith.cmpi eq, %16, %17 : vector<3x128xi32>
    %c15_i32 = arith.constant 15 : i32
    %19 = vector.broadcast %c15_i32 : i32 to vector<3x128xi32>
    %20 = arith.cmpi eq, %16, %19 : vector<3x128xi32>
    %c0 = arith.constant 0 : index
    %c0_4 = arith.constant 0 : index
    %c0_5 = arith.constant 0 : index
    %c0_6 = arith.constant 0 : index
    %21 = vector.load %arg2[%c0, %c0_4, %c0_5, %c0_6] : memref<1x3x3x128xf32, #tpu.memory_space<vmem>>, vector<1x1x3x128xf32>
    %22 = vector.shape_cast %21 : vector<1x1x3x128xf32> to vector<3x128xf32>
    %23 = vector.extract_strided_slice %22 {offsets = [0, 0], sizes = [3, 1], strides = [1, 1]} : vector<3x128xf32> to vector<3x1xf32>
    %24 = vector.extract_strided_slice %22 {offsets = [0, 0], sizes = [3, 127], strides = [1, 1]} : vector<3x128xf32> to vector<3x127xf32>
    %25 = tpu.concatenate %23, %24 in 1 : vector<3x1xf32>, vector<3x127xf32> -> vector<3x128xf32>
    %26 = vector.extract_strided_slice %22 {offsets = [0, 1], sizes = [3, 127], strides = [1, 1]} : vector<3x128xf32> to vector<3x127xf32>
    %27 = vector.extract_strided_slice %22 {offsets = [0, 127], sizes = [3, 1], strides = [1, 1]} : vector<3x128xf32> to vector<3x1xf32>
    %28 = tpu.concatenate %26, %27 in 1 : vector<3x127xf32>, vector<3x1xf32> -> vector<3x128xf32>
    %29 = arith.select %18, %28, %25 : vector<3x128xi1>, vector<3x128xf32>
    %30 = arith.select %20, %25, %28 : vector<3x128xi1>, vector<3x128xf32>
    %31 = tpu.concatenate %29, %22, %30 in 0 : vector<3x128xf32>, vector<3x128xf32>, vector<3x128xf32> -> vector<9x128xf32>
    %c0_7 = arith.constant 0 : index
    %c0_8 = arith.constant 0 : index
    %32 = vector.load %arg3[%c0_7, %c0_8] : memref<64x27xf32, #tpu.memory_space<vmem>>, vector<64x9xf32>
    %cst = arith.constant dense<0.000000e+00> : vector<64x128xf32>
    %33 = tpu.matmul %32, %31, %cst {dimension_numbers = #tpu.dot_dimension_numbers<[1], [0], [0], [1], [0, 0, 1, 1], [], []>} : vector<64x9xf32>, vector<9x128xf32>, vector<64x128xf32> -> vector<64x128xf32>
    %c0_9 = arith.constant 0 : index
    %c1 = arith.constant 1 : index
    %c0_10 = arith.constant 0 : index
    %c0_11 = arith.constant 0 : index
    %34 = vector.load %arg2[%c0_9, %c1, %c0_10, %c0_11] : memref<1x3x3x128xf32, #tpu.memory_space<vmem>>, vector<1x1x3x128xf32>
    %35 = vector.shape_cast %34 : vector<1x1x3x128xf32> to vector<3x128xf32>
    %36 = vector.extract_strided_slice %35 {offsets = [0, 0], sizes = [3, 1], strides = [1, 1]} : vector<3x128xf32> to vector<3x1xf32>
    %37 = vector.extract_strided_slice %35 {offsets = [0, 0], sizes = [3, 127], strides = [1, 1]} : vector<3x128xf32> to vector<3x127xf32>
    %38 = tpu.concatenate %36, %37 in 1 : vector<3x1xf32>, vector<3x127xf32> -> vector<3x128xf32>
    %39 = vector.extract_strided_slice %35 {offsets = [0, 1], sizes = [3, 127], strides = [1, 1]} : vector<3x128xf32> to vector<3x127xf32>
    %40 = vector.extract_strided_slice %35 {offsets = [0, 127], sizes = [3, 1], strides = [1, 1]} : vector<3x128xf32> to vector<3x1xf32>
    %41 = tpu.concatenate %39, %40 in 1 : vector<3x127xf32>, vector<3x1xf32> -> vector<3x128xf32>
    %42 = arith.select %18, %41, %38 : vector<3x128xi1>, vector<3x128xf32>
    %43 = arith.select %20, %38, %41 : vector<3x128xi1>, vector<3x128xf32>
    %44 = tpu.concatenate %42, %35, %43 in 0 : vector<3x128xf32>, vector<3x128xf32>, vector<3x128xf32> -> vector<9x128xf32>
    %c0_12 = arith.constant 0 : index
    %c9 = arith.constant 9 : index
    %45 = vector.load %arg3[%c0_12, %c9] : memref<64x27xf32, #tpu.memory_space<vmem>>, vector<64x9xf32>
    %cst_13 = arith.constant dense<0.000000e+00> : vector<64x128xf32>
    %46 = tpu.matmul %45, %44, %cst_13 {dimension_numbers = #tpu.dot_dimension_numbers<[1], [0], [0], [1], [0, 0, 1, 1], [], []>} : vector<64x9xf32>, vector<9x128xf32>, vector<64x128xf32> -> vector<64x128xf32>
    %47 = arith.addf %33, %46 : vector<64x128xf32>
    %c0_14 = arith.constant 0 : index
    %c2 = arith.constant 2 : index
    %c0_15 = arith.constant 0 : index
    %c0_16 = arith.constant 0 : index
    %48 = vector.load %arg2[%c0_14, %c2, %c0_15, %c0_16] : memref<1x3x3x128xf32, #tpu.memory_space<vmem>>, vector<1x1x3x128xf32>
    %49 = vector.shape_cast %48 : vector<1x1x3x128xf32> to vector<3x128xf32>
    %50 = vector.extract_strided_slice %49 {offsets = [0, 0], sizes = [3, 1], strides = [1, 1]} : vector<3x128xf32> to vector<3x1xf32>
    %51 = vector.extract_strided_slice %49 {offsets = [0, 0], sizes = [3, 127], strides = [1, 1]} : vector<3x128xf32> to vector<3x127xf32>
    %52 = tpu.concatenate %50, %51 in 1 : vector<3x1xf32>, vector<3x127xf32> -> vector<3x128xf32>
    %53 = vector.extract_strided_slice %49 {offsets = [0, 1], sizes = [3, 127], strides = [1, 1]} : vector<3x128xf32> to vector<3x127xf32>
    %54 = vector.extract_strided_slice %49 {offsets = [0, 127], sizes = [3, 1], strides = [1, 1]} : vector<3x128xf32> to vector<3x1xf32>
    %55 = tpu.concatenate %53, %54 in 1 : vector<3x127xf32>, vector<3x1xf32> -> vector<3x128xf32>
    %56 = arith.select %18, %55, %52 : vector<3x128xi1>, vector<3x128xf32>
    %57 = arith.select %20, %52, %55 : vector<3x128xi1>, vector<3x128xf32>
    %58 = tpu.concatenate %56, %49, %57 in 0 : vector<3x128xf32>, vector<3x128xf32>, vector<3x128xf32> -> vector<9x128xf32>
    %c0_17 = arith.constant 0 : index
    %c18 = arith.constant 18 : index
    %59 = vector.load %arg3[%c0_17, %c18] : memref<64x27xf32, #tpu.memory_space<vmem>>, vector<64x9xf32>
    %cst_18 = arith.constant dense<0.000000e+00> : vector<64x128xf32>
    %60 = tpu.matmul %59, %58, %cst_18 {dimension_numbers = #tpu.dot_dimension_numbers<[1], [0], [0], [1], [0, 0, 1, 1], [], []>} : vector<64x9xf32>, vector<9x128xf32>, vector<64x128xf32> -> vector<64x128xf32>
    %61 = arith.addf %47, %60 : vector<64x128xf32>
    %c0_19 = arith.constant 0 : index
    %c0_20 = arith.constant 0 : index
    %62 = vector.load %arg4[%c0_19, %c0_20] : memref<64x1xf32, #tpu.memory_space<vmem>>, vector<64x1xf32>
    %63 = vector.broadcast %62 : vector<64x1xf32> to vector<64x128xf32>
    %64 = arith.addf %61, %63 : vector<64x128xf32>
    %cst_21 = arith.constant 0.000000e+00 : f32
    %65 = vector.broadcast %cst_21 : f32 to vector<64x128xf32>
    %66 = arith.maximumf %64, %65 : vector<64x128xf32>
    %c0_22 = arith.constant 0 : index
    %c0_23 = arith.constant 0 : index
    %c0_24 = arith.constant 0 : index
    %67 = vector.load %arg5[%c0_22, %c0_23, %c0_24] : memref<1x64x128xf32, #tpu.memory_space<vmem>>, vector<1x64x128xf32>
    %68 = vector.shape_cast %67 : vector<1x64x128xf32> to vector<64x128xf32>
    %69 = vector.shape_cast %66 : vector<64x128xf32> to vector<1x64x128xf32>
    tpu.vector_store %arg5[%c0_22, %c0_23, %c0_24], %69 {strides = array<i32>} : memref<1x64x128xf32, #tpu.memory_space<vmem>>, vector<1x64x128xf32>,
    return
  }
  func.func @transform_0(%arg0: i32, %arg1: i32) -> (i32, i32, i32, i32) {
    %c0_i32 = arith.constant 0 : i32
    %c0_i32_0 = arith.constant 0 : i32
    %c0_i32_1 = arith.constant 0 : i32
    return %arg0, %c0_i32, %c0_i32_0, %arg1 : i32, i32, i32, i32
  }
  func.func @transform_1(%arg0: i32, %arg1: i32) -> (i32, i32) {
    %c0_i32 = arith.constant 0 : i32
    %c0_i32_0 = arith.constant 0 : i32
    %c0_i32_1 = arith.constant 0 : i32
    return %c0_i32, %c0_i32_0 : i32, i32
  }
  func.func @transform_2(%arg0: i32, %arg1: i32) -> (i32, i32) {
    %c0_i32 = arith.constant 0 : i32
    %c0_i32_0 = arith.constant 0 : i32
    %c0_i32_1 = arith.constant 0 : i32
    return %c0_i32, %c0_i32_0 : i32, i32
  }
  func.func @transform_3(%arg0: i32, %arg1: i32) -> (i32, i32, i32) {
    %c0_i32 = arith.constant 0 : i32
    %c0_i32_0 = arith.constant 0 : i32
    return %arg0, %c0_i32, %arg1 : i32, i32, i32
  }
}

</mosaic_0001>

<bundles_post_ra>
// kernel: tpu_custom_call.1
= control target key start
LH: loop header
LB: loop body
LE: loop exit
PB: predicated region body
PF: predicated region fallthrough
CT: control target
= control target key end

     0   :  { %8 = vsyncpa [#allocation4], 0  ;;  %s1274_s0 = inlined_call_operand.vmem [shape: f32[2,3,3,256], index: 0, kind: input, shape index: {}]   ;;  %s1275_s1 = inlined_call_operand.vmem [shape: f32[64,27], index: 1, kind: input, shape index: {}]   ;;  %s1276_s2 = inlined_call_operand.vmem [shape: f32[64,1], index: 2, kind: input, shape index: {}]   ;;  %s1277_s3 = inlined_call_operand.hbm [shape: f32[2,64,256], index: 3, kind: output, shape index: {}]  }
   0x1   :  { %10 = vsyncpa [#allocation4 + $0x1], 0  ;;  %s980_s12 = smov 0   ;;  %s982_s13 = smov 0  }
   0x2   :  { %s984_s14 = smov 0   ;;  %s986_s15 = smov 0  }
   0x3   :  { %s988_s16 = smov 0   ;;  %s990_s17 = smov 0  }
   0x4   :  { %s992_s18 = smov 0   ;;  %s994_s19 = smov 0  }
   0x5 LB: > { %s724_s20 = sadd.s32 4294967295, %s950_s19   ;;  %s725_s21 = sadd.s32 4294967294, %s950_s19   ;;  %s950_s19 = sphi %s994_s19, %s16_s19   ;;  %s946_s18 = sphi %s992_s18, %s1291_s18   ;;  %s942_s17 = sphi %s990_s17, %s1290_s17   ;;  %s938_s16 = sphi %s988_s16, %s1289_s16   ;;  %s934_s15 = sphi %s986_s15, %s1288_s15   ;;  %s930_s14 = sphi %s984_s14, %s1287_s14   ;;  %s926_s13 = sphi %s982_s13, %s1286_s13   ;;  %s922_s12 = sphi %s980_s12, %s1285_s12  }
   0x6   : > { %s25_s22 = sadd.s32 1, %s942_s17  ;;  %s28_s23 = sadd.s32 1, %s946_s18 }
   0x7   : > { %p26_p0 = scmp.ge.s32.totalorder %s25_s22, 2  ;;  %p44_p1 = scmp.ne.s32.totalorder %s930_s14, %s926_s13 }
   0x8   : > { %p45_p2 = scmp.eq.s32.totalorder %s950_s19, 0  ;;  %p118_p5 = scmp.eq.s32.totalorder %s724_s20, 3 }
   0x9   : > { %s1293_s22 = smov (%p26_p0, %s25_s22), 0  ;;  %s1295_s23 = smov (!%p26_p0, %s28_s23), %s946_s18 }
   0xa   : > { %s33_s24 = ssub.s32 %s942_s17, %s1293_s22  ;;  %p1032_p3 = por %p45_p2, %p44_p1 }
   0xb   : > { %p30_p4 = scmp.ge.s32.totalorder %s1295_s23, 2  ;;  %p123_p6 = scmp.ne.s32.totalorder %s926_s13, %s922_s12 }
   0xc   : > { %p124_p7 = scmp.eq.s32.totalorder %s725_s21, 3  ;;  %p1040_p8 = por %p118_p5, %p44_p1 }
   0xd   : > { %s1297_s23 = smov (%p30_p4, %s1295_s23), 0  ;;  %s37_s30 = sadd.s32 1, %s930_s14 }
   0xe   : > { %p1044_p9 = por %p124_p7, %p123_p6  ;;  %s32_s28 = ssub.s32 %s946_s18, %s1297_s23 }
   0xf   : > { %s34_s29 = sor.u32 %s33_s24, %s32_s28  ;;  %p727_p11 = scmp.ge.s32.totalorder %s950_s19, 4 }
  0x10   : > { %p35_p10 = scmp.eq.s32.totalorder %s34_s29, 0 }
  0x11   : > { %146 = sbr.rel (%p727_p11) target bundleno = 32 (0x20), region = 24 }
  0x12   : > { %s1052_s4 = scalar_select %p35_p10, %s930_s14, %s37_s30  }
  0x16   : > { %149 = sbr.rel (!%p1032_p3) target bundleno = 32 (0x20), region = 28  ;;  %s151_s5 = sand.u32 (%p1032_p3), 1, %s930_s14  }
  0x17   : > { %s772_s6 = smul.u32 (%p1032_p3), 6, %s946_s18 }
  0x18   : > { %s771_s7 = smul.u32 (%p1032_p3), 12, %s151_s5 }
  0x19   : > { %s155_s8 = sadd.s32 (%p1032_p3), %s942_s17, %s772_s6 }
  0x1a   : > { %s728_s9 = sshll.u32 (%p1032_p3), %s155_s8, 2  ;;  %s153_s21 = scalar_lea.vmem (%p1032_p3), [#allocation2], %s771_s7 }
  0x1b   : > { %s157_s20 = scalar_lea.vmem %s1274_s0, %s728_s9 }
  0x1c   : > { %v174_v0 = vld [vmem:[%s157_s20] sm:$0xf]  ;;  %v176_v1 = vld [vmem:[%s157_s20 + $0x8] sm:$0xf]  ;;  %v178_v2 = vld [vmem:[%s157_s20 + $0x10] sm:$0xf] }
  0x1d   : > { %175 = vst [vmem:[%s153_s21] sm:$0xf] %v174_v0 }
  0x1e   : > { %177 = vst [vmem:[%s153_s21 + $0x4] sm:$0xf] %v176_v1 }
  0x1f   : > { %179 = vst [vmem:[%s153_s21 + $0x8] sm:$0xf] %v178_v2 }
  0x20 PF: > { %p729_p12 = scmp.ge.s32.totalorder %s950_s19, 1  ;;  %p208_p13 = scmp.lt.s32.totalorder %s950_s19, 5 }
  0x22   : > { %p209_p0 = pnand %p729_p12, %p208_p13 }
  0x23   : > { %s1066_s24 = sand.u32 (!%p209_p0), 1, %s926_s13   ;;  %s952_s29 = smov (!%p209_p0), 1  }
  0x24   : > { %212 = sbr.rel (%p209_p0) target bundleno = 357 (0x165), region = 69  ;;  %s953_s30 = smov (!%p209_p0), 127  }
  0x25   : > { %s773_s25 = smul.u32 (!%p209_p0), 12, %s1066_s24  ;;  %s954_s9 = smov (!%p209_p0), 110  }
  0x26   : > { %s955_s10 = smov (!%p209_p0), 119   ;;  %s730_s21 = sshll.u32 (!%p209_p0), %s1066_s24, 6 }
  0x27   : > { %s217_s28 = scalar_lea.vmem (!%p209_p0), [#allocation2], %s773_s25  ;;  %s1219_s25 = scalar_lea.vmem (!%p209_p0), [#allocation3], %s730_s21 }
  0x28   : > { %s625_s8 = scalar_lea.sflag (!%p209_p0), [#allocation4], %s1066_s24  ;;  %s876_s21 = scalar_lea.hbm (!%p209_p0), %s1277_s3, 256 }
  0x29   : > { %v1069_v3 = vld [vmem:[%s217_s28 + $0x8] sm:$0x7]  ;;  %v1071_v4 = vld [vmem:[%s217_s28 + $0x4] sm:$0x7]  ;;  %v254_v5 = vld [vmem:[%s217_s28] sm:$0x7]  ;;  %v238_v14 = vlaneseq }
  0x2a   : > { %452 = vrot.lane.b32.xlu1 %v1069_v3, %s952_s29  ;;  %288 = vrot.lane.b32.xlu0 %v1071_v4, %s952_s29  ;;  %v277_v6 = vld [vmem:[%s1275_s1] sm:$0xff]  ;;  %v1083_v7 = vld [vmem:[%s1275_s1 + $0x30] sm:$0xff]  ;;  %vm259_vm0 = vcmask 7168   ;;  %vm264_vm1 = vcmask 1039360   ;;  %v268_v21 = vrot.slane %v254_v5, 5  ;;  %vm273_vm4 = vcmask 1042432  }
  0x2b   : > { %256 = vrot.lane.b32.xlu2 %v254_v5, %s952_s29  ;;  %v278_v8 = vld [vmem:[%s1275_s1 + $0x8] sm:$0xff]  ;;  %v1092_v9 = vld [vmem:[%s1275_s1 + $0x38] sm:$0xff]  ;;  %v279_v10 = vld [vmem:[%s1275_s1 + $0x10] sm:$0xff]  ;;  %v239_v15 = vand.u32 127, %v238_v14  ;;  %vm346_vm5 = vcmask 1040384   ;;  %vm275_vm6 = vcmask 1045504  }
  0x2c   : > { %v1101_v11 = vld [vmem:[%s1275_s1 + $0x18] sm:$0xff]  ;;  %v1107_v12 = vld [vmem:[%s1275_s1 + $0x20] sm:$0xff]  ;;  %v1115_v13 = vld [vmem:[%s1275_s1 + $0x28] sm:$0xff]  ;;  %vm329_vm7 = vcmask 72704   ;;  %v956_v32 = vmov 0   ;;  %v298_v33 = vrot.slane %v1071_v4, 5 }
  0x2d   : > { %v244_v17 = vand.u32 15, %v239_v15  ;;  %v552_v31 = vld [vmem:[%s1276_s2] sm:$0xff]  ;;  %853 = vset.pattern.permute.xlu1 %v956_v32  ;;  %855 = vset.pattern.permute.xlu0 %v956_v32  ;;  %v462_v34 = vrot.slane %v1069_v3, 5  ;;  %v555_v54 = vld [vmem:[%s1276_s2 + $0x18] sm:$0xff]  ;;  %v554_v55 = vld [vmem:[%s1276_s2 + $0x10] sm:$0xff]  ;;  %s761_s28 = sshll.u32 %s938_s16, 4 }
  0x2e   : > { %854 = vset.pattern.permute.xlu2 %v956_v32  ;;  %v557_v59 = vld [vmem:[%s1276_s2 + $0x28] sm:$0xff]  ;;  %v559_v60 = vld [vmem:[%s1276_s2 + $0x38] sm:$0xff]  ;;  %v556_v0 = vld [vmem:[%s1276_s2 + $0x20] sm:$0xff]  ;;  %s635_s29 = sadd.s32 %s934_s15, %s761_s28  ;;  %s638_s15 = sshll.u32 %s1219_s25, 4  ;;  %s639_s15 = int_to_ptr.vmem [resolvable:$true] %s638_s15 }
  0x2f   : > { %vm1122_vm2 = vcmp.eq.s32.totalorder %v244_v17, 0  ;;  %vm1126_vm3 = vcmp.eq.s32.totalorder %v244_v17, 15  ;;  %v553_v61 = vld [vmem:[%s1276_s2 + $0x8] sm:$0xff] }
  0x32   : > { %456 = vrot.lane.b32.xlu1 %v1069_v3, %s953_s30  ;;  %292 = vrot.lane.b32.xlu0 %v1071_v4, %s953_s30 }
  0x33   : > { %261 = vrot.lane.b32.xlu2 %v254_v5, %s953_s30  ;;  %s762_s30 = sshll.u32 %s635_s29, 3 }
  0x34   : > { %s637_s6 = scalar_lea.hbm %s1277_s3, %s762_s30 }
  0x35   : > { %s640_s7 = sshll.u32 %s637_s6, 4  ;;  %s641_s7 = int_to_ptr.hbm [resolvable:$true] %s640_s7 }
  0x36   : > { %s870_s11 = sshra.s32 %s641_s7, 4  ;;  %s871_s11 = int_to_ptr.hbm [resolvable:$true] %s870_s11 }
  0x37   : > { %p877_p4 = scmp.lt.s32.totalorder %s871_s11, %s1277_s3 }
  0x3a   : > { %469 = vrot.lane.b32.xlu1 %v277_v6, %s954_s9  ;;  %325 = vrot.lane.b32.xlu0 %v1083_v7, %s955_s10 }
  0x3b   : > { %313 = vrot.lane.b32.xlu2 %v277_v6, %s955_s10 }
  0x42   : > { %471 = vrot.lane.b32.xlu1 %v278_v8, %s954_s9  ;;  %327 = vrot.lane.b32.xlu0 %v1092_v9, %s955_s10 }
  0x43   : > { %315 = vrot.lane.b32.xlu2 %v278_v8, %s955_s10 }
  0x4a   : > { %473 = vrot.lane.b32.xlu0 %v279_v10, %s954_s9  ;;  %317 = vrot.lane.b32.xlu1 %v279_v10, %s955_s10 }
  0x4b   : > { %475 = vrot.lane.b32.xlu2 %v1101_v11, %s954_s9 }
  0x52   : > { %319 = vrot.lane.b32.xlu0 %v1101_v11, %s955_s10  ;;  %477 = vrot.lane.b32.xlu1 %v1107_v12, %s954_s9 }
  0x53   : > { %481 = vrot.lane.b32.xlu2 %v1083_v7, %s954_s9 }
  0x5a   : > { %321 = vrot.lane.b32.xlu0 %v1107_v12, %s955_s10  ;;  %479 = vrot.lane.b32.xlu1 %v1115_v13, %s954_s9 }
  0x5b   : > { %483 = vrot.lane.b32.xlu2 %v1092_v9, %s954_s9  ;;  %s872_s9 = scalar_lea.hbm %s871_s11, 64 }
  0x5c   : > { %p873_p1 = scmp.ne.s32.totalorder %s871_s11, %s872_s9  ;;  %p878_p5 = scmp.lt.s32.totalorder %s876_s21, %s872_s9 }
  0x5e   : > { %p874_p2 = pnand %p873_p1, %p1040_p8  ;;  %p879_p6 = por %p878_p5, %p877_p4 }
  0x60   : > { %p875_p3 = pneg %p874_p2 }
  0x62   : > { %323 = vrot.lane.b32.xlu0 %v1115_v13, %s955_s10  ;;  %562 = vperm.xlu1 %853, %v552_v31   ;;  %p880_p7 = pnand %p879_p6, %p875_p3 }
  0x63   : > { %567 = vperm.xlu2 %854, %v553_v61  }
  0x6a   : > { %577 = vperm.xlu1 %853, %v555_v54   ;;  %572 = vperm.xlu0 %855, %v554_v55  }
  0x6b   : > { %582 = vperm.xlu2 %854, %v556_v0  }
  0x72   : > { %587 = vperm.xlu1 %853, %v557_v59   ;;  %597 = vperm.xlu0 %855, %v559_v60  }
  0x85   : > { %v257_v16 = vpop.permute.xlu2 %256 }
  0x86   : > { %v260_v18 = vsel %vm259_vm0, %v254_v5, %v257_v16 }
  0x8d   : > { %v262_v22 = vpop.permute.xlu2 %261 }
  0x8e   : > { %v265_v23 = vsel %vm264_vm1, %v262_v22, %v254_v5 }
  0x8f   : > { %v266_v24 = vsel %vm1122_vm2, %v265_v23, %v260_v18  ;;  %v267_v25 = vsel %vm1126_vm3, %v260_v18, %v265_v23 }
  0x90   : > { %v271_v26 = vrot.slane %v267_v25, 2  ;;  %v274_v27 = vsel %vm273_vm4, %v266_v24, %v268_v21 }
  0x92   : > { %741 = vmatpush.msk.msra.mxu1 %vm346_vm5, %v271_v26  ;;  %v276_v28 = vsel %vm275_vm6, %v274_v27, %v271_v26 }
  0x94   : > { %423 = vmatpush.msra.mxu1 %v276_v28 }
  0x95   : > { %742 = vmatmul.msk.f32.vlgmr.msra.gmra.mxu1 %vm329_vm7, %v277_v6  ;;  %v314_v51 = vpop.permute.xlu2 %313 }
  0x9c   : > { %v453_v29 = vpop.permute.xlu1 %452  ;;  %v289_v30 = vpop.permute.xlu0 %288 }
  0x9d   : > { %743 = vmatmul.msk.f32.gmra.mxu1 %vm329_vm7, %v278_v8  ;;  %v455_v37 = vsel %vm259_vm0, %v1069_v3, %v453_v29  ;;  %v291_v38 = vsel %vm259_vm0, %v1071_v4, %v289_v30  ;;  %v316_v56 = vpop.permute.xlu2 %315 }
  0xa4   : > { %v457_v35 = vpop.permute.xlu1 %456  ;;  %v293_v36 = vpop.permute.xlu0 %292 }
  0xa5   : > { %v459_v39 = vsel %vm264_vm1, %v457_v35, %v1069_v3  ;;  %v295_v40 = vsel %vm264_vm1, %v293_v36, %v1071_v4  ;;  %744 = vmatmul.msk.f32.gmra.mxu1 %vm329_vm7, %v279_v10  ;;  %v476_v1 = vpop.permute.xlu2 %475  ;;  %v558_v3 = vld [vmem:[%s1276_s2 + $0x30] sm:$0xff] }
  0xa6   : > { %v460_v41 = vsel %vm1122_vm2, %v459_v39, %v455_v37  ;;  %v461_v42 = vsel %vm1126_vm3, %v455_v37, %v459_v39  ;;  %v296_v43 = vsel %vm1122_vm2, %v295_v40, %v291_v38  ;;  %v297_v44 = vsel %vm1126_vm3, %v291_v38, %v295_v40  ;;  %592 = vperm.xlu2 %854, %v558_v3  }
  0xa7   : > { %v301_v45 = vrot.slane %v297_v44, 2  ;;  %v465_v46 = vrot.slane %v461_v42, 2  ;;  %v303_v47 = vsel %vm273_vm4, %v296_v43, %v298_v33  ;;  %v467_v48 = vsel %vm273_vm4, %v460_v41, %v462_v34 }
  0xa9   : > { %732 = vmatpush.msk.msra.mxu0 %vm346_vm5, %v301_v45  ;;  %765 = vmatpush.msk.msra.mxu3 %vm346_vm5, %v301_v45  ;;  %v304_v49 = vsel %vm275_vm6, %v303_v47, %v301_v45  ;;  %v468_v50 = vsel %vm275_vm6, %v467_v48, %v465_v46 }
  0xaa   : > { %751 = vmatpush.msk.msra.mxu2 %vm346_vm5, %v465_v46 }
  0xab   : > { %364 = vmatpush.msra.mxu0 %v304_v49  ;;  %766 = vmatpush.msra.mxu3 %v304_v49 }
  0xac   : > { %518 = vmatpush.msra.mxu2 %v468_v50  ;;  %v470_v52 = vpop.permute.xlu1 %469  ;;  %v326_v53 = vpop.permute.xlu0 %325  ;;  %733 = vmatmul.msk.f32.vlgmr.msra.gmra.mxu0 %vm329_vm7, %v314_v51 }
  0xad   : > { %767 = vmatpush.msk.msrb.mxu3 %vm346_vm5, %v271_v26  ;;  %752 = vmatmul.msk.f32.vlgmr.msra.gmra.mxu2 %vm329_vm7, %v470_v52  ;;  %v482_v5 = vpop.permute.xlu2 %481 }
  0xae   : > { %739 = vmatmul.msk.f32.vlgmr.msra.gmra.mxu3 %vm329_vm7, %v326_v53  ;;  %745 = vmatmul.msk.f32.gmra.mxu1 %vm329_vm7, %v1101_v11 }
  0xaf   : > { %768 = vmatpush.msrb.mxu3 %v276_v28 }
  0xb1   : > { %769 = vmatpush.msk.msra.mxu3 %vm346_vm5, %v465_v46 }
  0xb3   : > { %770 = vmatpush.msra.mxu3 %v468_v50 }
  0xb4   : > { %v472_v57 = vpop.permute.xlu1 %471  ;;  %v328_v58 = vpop.permute.xlu0 %327  ;;  %734 = vmatmul.msk.f32.gmra.mxu0 %vm329_vm7, %v316_v56 }
  0xb5   : > { %753 = vmatmul.msk.f32.gmra.mxu2 %vm329_vm7, %v472_v57  ;;  %v484_v8 = vpop.permute.xlu2 %483 }
  0xb6   : > { %740 = vmatmul.msk.f32.gmra.mxu3 %vm329_vm7, %v328_v58  ;;  %746 = vmatmul.msk.f32.gmra.mxu1 %vm329_vm7, %v1107_v12 }
  0xbc   : > { %v474_v62 = vpop.permute.xlu0 %473  ;;  %v318_v63 = vpop.permute.xlu1 %317 }
  0xbd   : > { %754 = vmatmul.msk.f32.gmra.mxu2 %vm329_vm7, %v474_v62  ;;  %735 = vmatmul.msk.f32.gmra.mxu0 %vm329_vm7, %v318_v63  ;;  %v568_v23 = vpop.permute.xlu2 %567 }
  0xbe   : > { %748 = vmatmul.msk.f32.vlgmr.msrb.gmra.mxu3 %vm329_vm7, %v1083_v7  ;;  %747 = vmatmul.msk.f32.gmra.mxu1 %vm329_vm7, %v1115_v13 }
  0xc4   : > { %v320_v2 = vpop.permute.xlu0 %319  ;;  %v478_v4 = vpop.permute.xlu1 %477 }
  0xc5   : > { %755 = vmatmul.msk.f32.gmra.mxu2 %vm329_vm7, %v476_v1  ;;  %736 = vmatmul.msk.f32.gmra.mxu0 %vm329_vm7, %v320_v2  ;;  %v583_v40 = vpop.permute.xlu2 %582 }
  0xc6   : > { %749 = vmatmul.msk.f32.gmra.mxu3 %vm329_vm7, %v1092_v9 }
  0xcc   : > { %v322_v6 = vpop.permute.xlu0 %321  ;;  %v480_v7 = vpop.permute.xlu1 %479 }
  0xcd   : > { %756 = vmatmul.msk.f32.gmra.mxu2 %vm329_vm7, %v478_v4  ;;  %737 = vmatmul.msk.f32.gmra.mxu0 %vm329_vm7, %v322_v6 }
  0xce   : > { %758 = vmatmul.msk.f32.vlgmr.msra.gmra.mxu3 %vm329_vm7, %v482_v5 }
  0xd4   : > { %v324_v10 = vpop.permute.xlu0 %323  ;;  %v563_v14 = vpop.permute.xlu1 %562 }
  0xd5   : > { %757 = vmatmul.msk.f32.gmra.mxu2 %vm329_vm7, %v480_v7  ;;  %738 = vmatmul.msk.f32.gmra.mxu0 %vm329_vm7, %v324_v10 }
  0xd6   : > { %759 = vmatmul.msk.f32.gmra.mxu3 %vm329_vm7, %v484_v8 }
  0xdc   : > { %v573_v32 = vpop.permute.xlu0 %572  ;;  %v578_v45 = vpop.permute.xlu1 %577 }
  0xe4   : > { %v588_v4 = vpop.permute.xlu1 %587  ;;  %v598_v5 = vpop.permute.xlu0 %597 }
 0x100   : > { %v593_v55 = vpop.permute.xlu2 %592 }
 0x112   : > { %v425_v9 = vpop.f32.mrf.mxu1 }
 0x11a   : > { %v428_v11 = vpop.f32.mrf.mxu1 }
 0x122   : > { %v431_v20 = vpop.f32.mrf.mxu1 }
 0x129   : > { %v366_v12 = vpop.f32.mrf.mxu0 }
 0x12a   : > { %v426_v13 = vadd.f32 %v425_v9, %v366_v12 }
 0x12b   : > { %v434_v31 = vpop.f32.mrf.mxu1 }
 0x130   : > { %v520_v16 = vpop.f32.mrf.mxu2 }
 0x131   : > { %v384_v15 = vpop.f32.mrf.mxu3  ;;  %v544_v17 = vadd.f32 %v520_v16, %v426_v13  ;;  %v369_v19 = vpop.f32.mrf.mxu0 }
 0x132   : > { %v429_v22 = vadd.f32 %v428_v11, %v369_v19 }
 0x133   : > { %v600_v18 = vadd.f32 %v563_v14, %v544_v17  ;;  %v437_v41 = vpop.f32.mrf.mxu1 }
 0x135   : > { %v608_v21 = vmax.f32 %v600_v18, 0.0 }
 0x137   : > { %616 = vst [vmem:[%s1219_s25] sm:$0xff] %v608_v21 }
 0x138   : > { %v523_v25 = vpop.f32.mrf.mxu2 }
 0x139   : > { %v387_v24 = vpop.f32.mrf.mxu3  ;;  %v545_v26 = vadd.f32 %v523_v25, %v429_v22 }
 0x13a   : > { %v372_v28 = vpop.f32.mrf.mxu0 }
 0x13b   : > { %v601_v27 = vadd.f32 %v568_v23, %v545_v26  ;;  %v432_v30 = vadd.f32 %v431_v20, %v372_v28  ;;  %v440_v56 = vpop.f32.mrf.mxu1 }
 0x13d   : > { %v609_v29 = vmax.f32 %v601_v27, 0.0 }
 0x13f   : > { %617 = vst [vmem:[%s1219_s25 + $0x8] sm:$0xff] %v609_v29 }
 0x140   : > { %v526_v34 = vpop.f32.mrf.mxu2 }
 0x141   : > { %v443_v33 = vpop.f32.mrf.mxu3  ;;  %v546_v35 = vadd.f32 %v526_v34, %v432_v30 }
 0x142   : > { %v375_v37 = vpop.f32.mrf.mxu0  ;;  %v444_v50 = vadd.f32 %v443_v33, %v384_v15 }
 0x143   : > { %v602_v36 = vadd.f32 %v573_v32, %v546_v35  ;;  %v435_v39 = vadd.f32 %v434_v31, %v375_v37 }
 0x145   : > { %v610_v38 = vmax.f32 %v602_v36, 0.0 }
 0x147   : > { %618 = vst [vmem:[%s1219_s25 + $0x10] sm:$0xff] %v610_v38 }
 0x148   : > { %v529_v43 = vpop.f32.mrf.mxu2 }
 0x149   : > { %v446_v42 = vpop.f32.mrf.mxu3  ;;  %v547_v44 = vadd.f32 %v529_v43, %v435_v39 }
 0x14a   : > { %v378_v47 = vpop.f32.mrf.mxu0  ;;  %v447_v63 = vadd.f32 %v446_v42, %v387_v24 }
 0x14b   : > { %v603_v46 = vadd.f32 %v578_v45, %v547_v44  ;;  %v438_v49 = vadd.f32 %v437_v41, %v378_v47 }
 0x14d   : > { %v611_v48 = vmax.f32 %v603_v46, 0.0 }
 0x14f   : > { %619 = vst [vmem:[%s1219_s25 + $0x18] sm:$0xff] %v611_v48 }
 0x150   : > { %v532_v51 = vpop.f32.mrf.mxu2 }
 0x151   : > { %v538_v52 = vpop.f32.mrf.mxu3  ;;  %v548_v53 = vadd.f32 %v532_v51, %v438_v49 }
 0x152   : > { %v550_v54 = vadd.f32 %v538_v52, %v444_v50  ;;  %v381_v59 = vpop.f32.mrf.mxu0 }
 0x153   : > { %v604_v57 = vadd.f32 %v583_v40, %v548_v53  ;;  %v441_v62 = vadd.f32 %v440_v56, %v381_v59 }
 0x154   : > { %v606_v58 = vadd.f32 %v593_v55, %v550_v54 }
 0x155   : > { %v612_v60 = vmax.f32 %v604_v57, 0.0 }
 0x156   : > { %v614_v61 = vmax.f32 %v606_v58, 0.0 }
 0x157   : > { %620 = vst [vmem:[%s1219_s25 + $0x20] sm:$0xff] %v612_v60 }
 0x158   : > { %622 = vst [vmem:[%s1219_s25 + $0x30] sm:$0xff] %v614_v61  ;;  %v535_v0 = vpop.f32.mrf.mxu2 }
 0x159   : > { %v541_v1 = vpop.f32.mrf.mxu3  ;;  %v549_v2 = vadd.f32 %v535_v0, %v441_v62 }
 0x15a   : > { %v551_v3 = vadd.f32 %v541_v1, %v447_v63 }
 0x15b   : > { %v605_v6 = vadd.f32 %v588_v4, %v549_v2 }
 0x15c   : > { %v607_v7 = vadd.f32 %v598_v5, %v551_v3 }
 0x15d   : > { %v613_v8 = vmax.f32 %v605_v6, 0.0 }
 0x15e   : > { %v615_v10 = vmax.f32 %v607_v7, 0.0 }
 0x15f   : > { %621 = vst [vmem:[%s1219_s25 + $0x28] sm:$0xff] %v613_v8 }
 0x160   : > { %623 = vst [vmem:[%s1219_s25 + $0x38] sm:$0xff] %v615_v10 }
 0x161   : > { %883 = shalt.err (!%p880_p7)
}
 0x162   : > { %s957_s24 = smov 128   ;;  %s958_s25 = smov 256  }
 0x163   : > { %s959_s30 = smov 8  }
 0x164   : > { %774 = dma.vmem_to_hbm [thread:$0]  (%p1040_p8), %s639_s15, 1024, %s641_s7, %s625_s8, %s957_s24, %s958_s25, %s959_s30  }
 0x165 PF: > { %p780_p10 = scmp.ge.s32.totalorder %s950_s19, 2  ;;  %s655_s16 = sand.u32 1, %s922_s12  }
 0x166   : > { %s656_s5 = scalar_lea.sflag [#allocation4], %s655_s16 }
 0x167   : > { %p777_p11 = pnand %p780_p10, %p1044_p9 }
 0x169   : > { %p778_p12 = pneg %p777_p11 }
 0x16b   : > { %917 = dma.done.wait (%p778_p12), %s656_s5, 1024  }
 0x16c   : > { %919 = vsyncadd (%p778_p12), %s656_s5, 4294966272  ;;  %s16_s19 = sadd.s32 1, %s950_s19   ;;  %s1285_s12 = smov %s926_s13 }
 0x16d   : > { %p13_p13 = scmp.ge.s32.totalorder %s16_s19, 6   ;;  %s1286_s13 = smov %s930_s14 }
 0x16e   : > { %s1287_s14 = smov %s1052_s4  ;;  %s1288_s15 = smov %s942_s17 }
 0x16f   : > { %s1289_s16 = smov %s946_s18  ;;  %s1290_s17 = smov %s1293_s22 }
 0x170   : > { %s1291_s18 = smov %s1297_s23  ;;  %15 = sbr.rel (!%p13_p13) target bundleno = 5 (0x5), region = 115 }
 0x175   :  { %662 = vsyncpa [#allocation4], 1 }
 0x176   :  { %664 = vsyncpa [#allocation4 + $0x1], 1 }

</bundles_post_ra>
